<compile_context>
chip_gen: v7x
topology: tpu7x:2x2x1
jax: 0.10.0
libtpu: 0.0.40
codegen_flags: <defaults>
</compile_context>

<pallas_src>
import jax
import jax.numpy as jnp
from jax.experimental import pallas as pl
from jax.experimental.pallas import tpu as pltpu


def _copy_kernel(x_ref, o_ref):
    # Flatten has zero arithmetic; the kernel is a lane/sublane-dense tile copy.
    o_ref[...] = x_ref[...]


def _largest_divisor_le(n, cap):
    """Largest divisor of n that is <= cap, preferring multiples of 8."""
    best, best_mult8 = 1, None
    d = 1
    while d * d <= n:
        if n % d == 0:
            for cand in (d, n // d):
                if cand <= cap:
                    if cand % 8 == 0 and (best_mult8 is None or cand > best_mult8):
                        best_mult8 = cand
                    if cand > best:
                        best = cand
        d += 1
    return best_mult8 if best_mult8 is not None else best


def flatten_pallas(x, *, target_block_bytes=2 * 1024 * 1024):
    """Equivalent of torch `x.view(x.size(0), -1)`, materialized by a Pallas copy."""
    n = x.shape[0]
    d = 1
    for s in x.shape[1:]:
        d *= s

    # Metadata-only reshape; same row-major element order as torch's .view.
    x2 = x.reshape(n, d)
    total = n * d
    itemsize = jnp.dtype(x.dtype).itemsize

    # Pick the widest lane-dense width (multiple of 128) that divides the total
    # element count -> unmasked full-width vector stores.
    lane_w = None
    for c in (8192, 4096, 2048, 1024, 512, 256, 128):
        if total % c == 0:
            lane_w = c
            break

    if lane_w is None:
        # TODO(synk): total not divisible by 128 — fall back to one full-extent
        # block (still exact, but lowers to masked partial stores).
        return pl.pallas_call(
            _copy_kernel,
            out_shape=jax.ShapeDtypeStruct((n, d), x.dtype),
            grid_spec=pltpu.PrefetchScalarGridSpec(
                num_scalar_prefetch=0,
                grid=(1,),
                in_specs=[pl.BlockSpec((n, d), lambda i: (0, 0))],
                out_specs=pl.BlockSpec((n, d), lambda i: (0, 0)),
            ),
            compiler_params=pltpu.CompilerParams(
                dimension_semantics=("arbitrary",),
            ),
        )(x2)

    rows = total // lane_w
    row_bytes = lane_w * itemsize
    target_rows = max(1, target_block_bytes // row_bytes)
    if rows <= target_rows:
        block_rows = rows  # full extent along sublanes -> always legal
    else:
        block_rows = _largest_divisor_le(rows, target_rows)

    # Another metadata-only reshape: row-major flatten preserves element order,
    # so (rows, lane_w) holds exactly the same element stream as (n, d).
    xf = x2.reshape(rows, lane_w)
    grid = (rows // block_rows,)

    yf = pl.pallas_call(
        _copy_kernel,
        out_shape=jax.ShapeDtypeStruct((rows, lane_w), x.dtype),
        grid_spec=pltpu.PrefetchScalarGridSpec(
            num_scalar_prefetch=0,
            grid=grid,
            in_specs=[pl.BlockSpec((block_rows, lane_w), lambda i: (i, 0))],
            out_specs=pl.BlockSpec((block_rows, lane_w), lambda i: (i, 0)),
        ),
        compiler_params=pltpu.CompilerParams(
            dimension_semantics=("parallel",),
        ),
    )(xf)

    return yf.reshape(n, d)


if __name__ == "__main__":
    key = jax.random.PRNGKey(0)
    # Small NCHW input consistent with a conv feature map going into Flatten.
    x = jax.random.normal(key, (2, 4, 16, 16), dtype=jnp.float32)

    y = flatten_pallas(x)
    y = jax.block_until_ready(y)

    ref = x.reshape(x.shape[0], -1)
    assert y.shape == (2, 4 * 16 * 16), y.shape
    assert y.dtype == x.dtype
    assert bool(jnp.array_equal(y, ref)), "Pallas flatten does not match reference"

    print("KERNEL_OK")
</pallas_src>

<mosaic_0001>
module attributes {stable_mosaic.version = 11 : i64} {
  func.func @_copy_kernel(%arg0: i32, %arg1: memref<1x2048xf32, #tpu.memory_space<vmem>>, %arg2: memref<1x2048xf32, #tpu.memory_space<vmem>>) attributes {dimension_semantics = [#tpu.dimension_semantics<parallel>], iteration_bounds = array<i64: 1>, scalar_prefetch = 0 : i64, scratch_operands = 0 : i64, tpu.core_type = #tpu.core_type<tc>, window_params = [{transform_indices = @transform_0, window_bounds = array<i64: 1, 2048>}, {transform_indices = @transform_1, window_bounds = array<i64: 1, 2048>}]} {
    %c0 = arith.constant 0 : index
    %c0_0 = arith.constant 0 : index
    %0 = vector.load %arg1[%c0, %c0_0] : memref<1x2048xf32, #tpu.memory_space<vmem>>, vector<1x2048xf32>
    %c0_1 = arith.constant 0 : index
    %c0_2 = arith.constant 0 : index
    %1 = vector.load %arg2[%c0_1, %c0_2] : memref<1x2048xf32, #tpu.memory_space<vmem>>, vector<1x2048xf32>
    tpu.vector_store %arg2[%c0_1, %c0_2], %0 {strides = array<i32>} : memref<1x2048xf32, #tpu.memory_space<vmem>>, vector<1x2048xf32>,
    return
  }
  func.func @transform_0(%arg0: i32) -> (i32, i32) {
    %c0_i32 = arith.constant 0 : i32
    %c0_i32_0 = arith.constant 0 : i32
    return %arg0, %c0_i32 : i32, i32
  }
  func.func @transform_1(%arg0: i32) -> (i32, i32) {
    %c0_i32 = arith.constant 0 : i32
    %c0_i32_0 = arith.constant 0 : i32
    return %arg0, %c0_i32 : i32, i32
  }
}

</mosaic_0001>

<bundles_post_ra>
// kernel: tpu_custom_call.1
= control target key start
LH: loop header
LB: loop body
LE: loop exit
PB: predicated region body
PF: predicated region fallthrough
CT: control target
= control target key end

     0   :  { %6 = vsyncpa [#allocation3], 0  ;;  %s126_s0 = inlined_call_operand.hbm [shape: f32[1,2048], index: 0, kind: input, shape index: {}]   ;;  %s127_s1 = inlined_call_operand.hbm [shape: f32[1,2048], index: 1, kind: output, shape index: {}]  }
   0x1   :  { %7 = vsyncpa [#allocation4], 0  ;;  %s90_s6 = smov [#allocation2]   ;;  %s42_s10 = scalar_lea.hbm %s126_s0, 256 }
   0x2   :  { %s14_s7 = sshll.u32 %s90_s6, 4  ;;  %p43_p0 = scmp.ne.s32.totalorder %s126_s0, %s42_s10  ;;  %s15_s7 = int_to_ptr.vmem [resolvable:$true] %s14_s7 }
   0x3   :  { %p46_p1 = scmp.lt.u32.totalorder %s42_s10, %s126_s0 }
   0x5   :  { %p48_p2 = pnand %p46_p1, %p43_p0 }
   0x7   :  { %51 = shalt.err (!%p48_p2)
}
   0x8   :  { %s52_s15 = scalar_lea.vmem %s15_s7, 256  ;;  %p57_p4 = scmp.lt.s32.totalorder %s15_s7, %s15_s7 }
   0x9   :  { %p53_p3 = scmp.ne.s32.totalorder %s15_s7, %s52_s15  ;;  %p58_p5 = scmp.lt.s32.totalorder %s52_s15, %s52_s15 }
   0xb   :  { %p59_p6 = por %p58_p5, %p57_p4 }
   0xd   :  { %p60_p7 = pnand %p59_p6, %p53_p3 }
   0xf   :  { %63 = shalt.err (!%p60_p7)
}
  0x10   :  { %17 = dma.hbm_to_vmem [thread:$0]  %s126_s0, 256, %s15_s7, [#allocation3]  }
  0x11   :  { %86 = dma.done.wait [#allocation3], 256  }
  0x12   :  { %87 = vsyncadd [#allocation3], 4294967040  ;;  %s91_s18 = smov [#allocation5]   ;;  %v21_v0 = vld [vmem:[#allocation2] sm:$0xff]  ;;  %v22_v1 = vld [vmem:[#allocation2 + $0x8] sm:$0xff] }
  0x13   :  { %s31_s19 = sshll.u32 %s91_s18, 4  ;;  %23 = vst [vmem:[#allocation5] sm:$0xff] %v21_v0  ;;  %24 = vst [vmem:[#allocation5 + $0x8] sm:$0xff] %v22_v1  ;;  %s32_s19 = int_to_ptr.vmem [resolvable:$true] %s31_s19 }
  0x14   :  { %s64_s20 = scalar_lea.vmem %s32_s19, 256  ;;  %p69_p9 = scmp.lt.s32.totalorder %s32_s19, %s32_s19 }
  0x15   :  { %p65_p8 = scmp.ne.s32.totalorder %s32_s19, %s64_s20  ;;  %p70_p10 = scmp.lt.s32.totalorder %s64_s20, %s64_s20 }
  0x17   :  { %p71_p11 = por %p70_p10, %p69_p9 }
  0x19   :  { %p72_p12 = pnand %p71_p11, %p65_p8 }
  0x1b   :  { %75 = shalt.err (!%p72_p12)
}
  0x1c   :  { %s76_s0 = scalar_lea.hbm %s127_s1, 256 }
  0x1d   :  { %p77_p13 = scmp.ne.s32.totalorder %s127_s1, %s76_s0  ;;  %p80_p0 = scmp.lt.u32.totalorder %s76_s0, %s127_s1 }
  0x1f   :  { %p82_p1 = pnand %p80_p0, %p77_p13 }
  0x21   :  { %85 = shalt.err (!%p82_p1)
}
  0x22   :  { %34 = dma.vmem_to_hbm [thread:$0]  %s32_s19, 256, %s127_s1, [#allocation4]  }
  0x23   :  { %88 = dma.done.wait [#allocation4], 256  }
  0x24   :  { %89 = vsyncadd [#allocation4], 4294967040 }
  0x25   :  { %38 = vsyncpa [#allocation3], 1 }
  0x26   :  { %39 = vsyncpa [#allocation4], 1 }

</bundles_post_ra>
